<compile_context>
chip_gen: v7x
topology: tpu7x:2x2x1
jax: 0.10.0
libtpu: 0.0.40
codegen_flags: <defaults>
</compile_context>

<pallas_src>
import math

import jax
import jax.numpy as jnp
from jax.experimental import pallas as pl
from jax.experimental.pallas import tpu as pltpu


def _channel_modulation_kernel(scale_ref, bias_ref, x_ref, o_ref):
    # scale_ref / bias_ref: (1, tile_d); x_ref / o_ref: (tile_r, tile_d).
    # (1, tile_d) -> (tile_r, tile_d) broadcast happens on the VPU; do not pre-broadcast.
    o_ref[...] = scale_ref[...] * x_ref[...] + bias_ref[...]


def _sublane_multiple(dtype):
    itemsize = jnp.dtype(dtype).itemsize
    # 8 rows/vreg for f32, 16 for bf16, 32 for int8 — keep row tiles fully packed.
    return max(8, 32 // max(itemsize, 1))


def _lane_fold_factor(rows, d, itemsize, target_tile_bytes):
    """Smallest k folding k consecutive rows into the lane axis so (k*d) % 128 == 0.

    Returns 1 when D is already lane-dense, when k does not divide rows, or when a
    single folded row would blow the tile budget.
    """
    if d % 128 == 0:
        return 1
    k = 128 // math.gcd(d, 128)
    if k > 1 and rows % k == 0 and k * d * itemsize <= target_tile_bytes:
        return k
    return 1


def _round_up(x, m):
    return ((x + m - 1) // m) * m


def _pick_tiles(rows, d, dtype, target_tile_bytes):
    itemsize = jnp.dtype(dtype).itemsize
    sub = _sublane_multiple(dtype)

    # Prefer full-D tiles: contiguous HBM bursts, no redundant param DMA. Only split D
    # (lane-dense, multiple of 128) when even a single sublane slab exceeds the budget.
    if d % 128 != 0 or d * itemsize * sub <= target_tile_bytes:
        tile_d = d
    else:
        tile_d = min(d, max(128, (target_tile_bytes // (sub * itemsize)) // 128 * 128))

    # Largest row tile (multiple of the sublane pack) inside the byte budget.
    tile_r_max = max(sub, (target_tile_bytes // (tile_d * itemsize)) // sub * sub)

    # v7x shards "parallel" grid axes across its 2 TensorCores: keep >= 2 row blocks
    # whenever there is enough work (no-op on single-TC v5e/v6e).
    min_row_blocks = 2 if rows >= 2 * sub else 1
    n_row_blocks = max(min_row_blocks, pl.cdiv(rows, tile_r_max))

    if n_row_blocks == 1:
        # Full-extent block: legal regardless of rows % sub.
        tile_r = rows
    else:
        # Even the blocks out so the remainder block isn't a tiny, fully padded DMA.
        tile_r = min(_round_up(pl.cdiv(rows, n_row_blocks), sub), tile_r_max)
    return tile_r, tile_d


def channel_modulation(x, scale, bias=None, *, use_pallas=None,
                       target_tile_bytes=4 << 20,      # ~4 MiB per x tile
                       vmem_limit_bytes=32 << 20):     # safe on v5e/v6e/v7x
    """y[..., d] = scale[d] * x[..., d] + bias[d]  (channel dim last)."""
    d = x.shape[-1]
    assert scale.shape == (d,)
    if bias is None:
        bias = jnp.zeros((d,), dtype=x.dtype)
    assert bias.shape == (d,)

    # Keep the math in the input dtype (single mul+add -> no accumulation concern).
    scale = scale.astype(x.dtype)
    bias = bias.astype(x.dtype)

    itemsize = jnp.dtype(x.dtype).itemsize
    if use_pallas is None:
        # Below a few MiB, pallas_call launch + pipeline prologue dwarf the HBM traffic;
        # a fused XLA elementwise is already at roofline.
        use_pallas = x.size * itemsize >= (4 << 20)
    if not use_pallas:
        return scale * x + bias

    # Clamp the tile budget against the scoped VMEM limit (and, when queryable, the
    # chip's physical VMEM — v7x has only 64 MiB/TC). Double-buffered in+out = 4x tile.
    try:
        phys = pltpu.get_tpu_info().vmem_capacity_bytes
        vmem_limit_bytes = min(vmem_limit_bytes, (phys * 3) // 4)
    except Exception:
        pass
    target_tile_bytes = min(target_tile_bytes, max(64 << 10, vmem_limit_bytes // 6))

    orig_shape = x.shape
    x2d = x.reshape(-1, d)
    rows = x2d.shape[0]

    # Lane-densify narrow channel dims by folding k rows into the lane axis.
    k = _lane_fold_factor(rows, d, itemsize, target_tile_bytes)
    if k > 1:
        x2d = x2d.reshape(rows // k, k * d)
        scale_row = jnp.tile(scale, k)[None, :]
        bias_row = jnp.tile(bias, k)[None, :]
        rows_eff, d_eff = rows // k, k * d
    else:
        scale_row = scale[None, :]
        bias_row = bias[None, :]
        rows_eff, d_eff = rows, d

    tile_r, tile_d = _pick_tiles(rows_eff, d_eff, x.dtype, target_tile_bytes)
    grid = (pl.cdiv(rows_eff, tile_r), pl.cdiv(d_eff, tile_d))

    out2d = pl.pallas_call(
        _channel_modulation_kernel,
        out_shape=jax.ShapeDtypeStruct((rows_eff, d_eff), x.dtype),
        grid_spec=pltpu.PrefetchScalarGridSpec(
            num_scalar_prefetch=0,
            grid=grid,
            in_specs=[
                pl.BlockSpec((1, tile_d), lambda i, j: (0, j)),        # scale row
                pl.BlockSpec((1, tile_d), lambda i, j: (0, j)),        # bias row
                pl.BlockSpec((tile_r, tile_d), lambda i, j: (i, j)),   # x tile
            ],
            out_specs=pl.BlockSpec((tile_r, tile_d), lambda i, j: (i, j)),
        ),
        compiler_params=pltpu.CompilerParams(
            dimension_semantics=("parallel", "parallel"),
            vmem_limit_bytes=vmem_limit_bytes,
        ),
    )(scale_row, bias_row, x2d)
    return out2d.reshape(orig_shape)


def _reference(x, scale, bias):
    return scale.astype(x.dtype) * x + bias.astype(x.dtype)


if __name__ == "__main__":
    key = jax.random.PRNGKey(0)
    k1, k2, k3, k4, k5, k6 = jax.random.split(key, 6)

    # Case 1: D multiple of 128, small shape forced through Pallas (full-D tile,
    # 2 row blocks -> both v7x TCs would stream).
    D = 256
    x1 = jax.random.normal(k1, (2, 16, D), dtype=jnp.float32)
    scale1 = 1.0 + 0.1 * jax.random.normal(k2, (D,), jnp.float32)
    bias1 = 0.1 * jax.random.normal(k3, (D,), jnp.float32)
    y1 = jax.block_until_ready(channel_modulation(x1, scale1, bias1, use_pallas=True))
    assert jnp.allclose(y1, _reference(x1, scale1, bias1), atol=1e-6), "case1 mismatch"

    # Case 2: D = 48 with rows divisible by the fold factor (k=8) -> lane-densified
    # to an effective last dim of 384 (unmasked stores).
    x2 = jax.random.normal(k4, (2, 8, 48), dtype=jnp.float32)
    scale2 = 1.0 + 0.05 * jax.random.normal(k5, (48,), jnp.float32)
    bias2 = 0.05 * jax.random.normal(k6, (48,), jnp.float32)
    y2 = jax.block_until_ready(channel_modulation(x2, scale2, bias2, use_pallas=True))
    assert jnp.allclose(y2, _reference(x2, scale2, bias2), atol=1e-6), "case2 mismatch"

    # Case 3: D = 48 with rows NOT divisible by the fold factor -> full-D fallback path
    # (correct, masked narrow stores).
    x3 = jax.random.normal(k1, (2, 7, 48), dtype=jnp.float32)
    y3 = jax.block_until_ready(channel_modulation(x3, scale2, bias2, use_pallas=True))
    assert jnp.allclose(y3, _reference(x3, scale2, bias2), atol=1e-6), "case3 mismatch"

    # Case 4: bf16 inputs (rows packed 2/sublane; math stays in bf16).
    x4 = jax.random.normal(k2, (48, 128), dtype=jnp.float32).astype(jnp.bfloat16)
    s4 = scale1[:128].astype(jnp.bfloat16)
    b4 = bias1[:128].astype(jnp.bfloat16)
    y4 = jax.block_until_ready(channel_modulation(x4, s4, b4, use_pallas=True))
    ref4 = _reference(x4, s4, b4)
    assert jnp.allclose(y4.astype(jnp.float32), ref4.astype(jnp.float32), atol=2e-2), "case4 mismatch"

    # Case 5: multi-block grid with a partial (masked) remainder row-block: tiny tile
    # budget forces tile_r=32 over 100 rows -> grid (4, 1), last block covers 4 rows.
    x5 = jax.random.normal(k3, (100, 128), dtype=jnp.float32)
    y5 = jax.block_until_ready(
        channel_modulation(x5, scale1[:128], bias1[:128],
                           use_pallas=True, target_tile_bytes=16 << 10))
    assert jnp.allclose(y5, _reference(x5, scale1[:128], bias1[:128]), atol=1e-6), "case5 mismatch"

    # Case 6: tiny problem takes the automatic non-Pallas fallback (semantics identical).
    x6 = jax.random.normal(k4, (16, 128), dtype=jnp.float32)
    y6 = jax.block_until_ready(channel_modulation(x6, scale1[:128], bias1[:128]))
    assert jnp.allclose(y6, _reference(x6, scale1[:128], bias1[:128]), atol=1e-6), "case6 mismatch"

    print("KERNEL_OK")
</pallas_src>

<mosaic_0001>
module attributes {stable_mosaic.version = 11 : i64} {
  func.func @_channel_modulation_kernel(%arg0: i32, %arg1: i32, %arg2: memref<1x256xf32, #tpu.memory_space<vmem>>, %arg3: memref<1x256xf32, #tpu.memory_space<vmem>>, %arg4: memref<16x256xf32, #tpu.memory_space<vmem>>, %arg5: memref<16x256xf32, #tpu.memory_space<vmem>>) attributes {dimension_semantics = [#tpu.dimension_semantics<parallel>, #tpu.dimension_semantics<parallel>], iteration_bounds = array<i64: 2, 1>, scalar_prefetch = 0 : i64, scratch_operands = 0 : i64, tpu.core_type = #tpu.core_type<tc>, window_params = [{transform_indices = @transform_0, window_bounds = array<i64: 1, 256>}, {transform_indices = @transform_1, window_bounds = array<i64: 1, 256>}, {transform_indices = @transform_2, window_bounds = array<i64: 16, 256>}, {transform_indices = @transform_3, window_bounds = array<i64: 16, 256>}]} {
    %c0 = arith.constant 0 : index
    %c0_0 = arith.constant 0 : index
    %0 = vector.load %arg2[%c0, %c0_0] : memref<1x256xf32, #tpu.memory_space<vmem>>, vector<1x256xf32>
    %c0_1 = arith.constant 0 : index
    %c0_2 = arith.constant 0 : index
    %1 = vector.load %arg4[%c0_1, %c0_2] : memref<16x256xf32, #tpu.memory_space<vmem>>, vector<16x256xf32>
    %2 = vector.broadcast %0 : vector<1x256xf32> to vector<16x256xf32>
    %3 = arith.mulf %2, %1 : vector<16x256xf32>
    %c0_3 = arith.constant 0 : index
    %c0_4 = arith.constant 0 : index
    %4 = vector.load %arg3[%c0_3, %c0_4] : memref<1x256xf32, #tpu.memory_space<vmem>>, vector<1x256xf32>
    %5 = vector.broadcast %4 : vector<1x256xf32> to vector<16x256xf32>
    %6 = arith.addf %3, %5 : vector<16x256xf32>
    %c0_5 = arith.constant 0 : index
    %c0_6 = arith.constant 0 : index
    %7 = vector.load %arg5[%c0_5, %c0_6] : memref<16x256xf32, #tpu.memory_space<vmem>>, vector<16x256xf32>
    tpu.vector_store %arg5[%c0_5, %c0_6], %6 {strides = array<i32>} : memref<16x256xf32, #tpu.memory_space<vmem>>, vector<16x256xf32>,
    return
  }
  func.func @transform_0(%arg0: i32, %arg1: i32) -> (i32, i32) {
    %c0_i32 = arith.constant 0 : i32
    %c0_i32_0 = arith.constant 0 : i32
    return %c0_i32, %arg1 : i32, i32
  }
  func.func @transform_1(%arg0: i32, %arg1: i32) -> (i32, i32) {
    %c0_i32 = arith.constant 0 : i32
    %c0_i32_0 = arith.constant 0 : i32
    return %c0_i32, %arg1 : i32, i32
  }
  func.func @transform_2(%arg0: i32, %arg1: i32) -> (i32, i32) {
    %c0_i32 = arith.constant 0 : i32
    return %arg0, %arg1 : i32, i32
  }
  func.func @transform_3(%arg0: i32, %arg1: i32) -> (i32, i32) {
    %c0_i32 = arith.constant 0 : i32
    return %arg0, %arg1 : i32, i32
  }
}

</mosaic_0001>

<bundles_post_ra>
// kernel: tpu_custom_call.1
= control target key start
LH: loop header
LB: loop body
LE: loop exit
PB: predicated region body
PF: predicated region fallthrough
CT: control target
= control target key end

     0   :  { %8 = vsyncpa [#allocation3], 0  ;;  %s921_s0 = inlined_call_operand.hbm [shape: f32[1,256], index: 0, kind: input, shape index: {}]   ;;  %s922_s1 = inlined_call_operand.vmem [shape: f32[1,256], index: 1, kind: input, shape index: {}]   ;;  %s923_s2 = inlined_call_operand.hbm [shape: f32[32,256], index: 2, kind: input, shape index: {}]   ;;  %s924_s3 = inlined_call_operand.hbm [shape: f32[32,256], index: 3, kind: output, shape index: {}]  }
   0x1   :  { %9 = vsyncpa [#allocation6], 0 }
   0x2   :  { %11 = vsyncpa [#allocation6 + $0x1], 0 }
   0x3   :  { %12 = vsyncpa [#allocation4], 0 }
   0x4   :  { %14 = vsyncpa [#allocation4 + $0x1], 0  ;;  %s697_s12 = smov 0   ;;  %s699_s13 = smov 0  }
   0x5   :  { %s701_s14 = smov 0   ;;  %s703_s15 = smov 0  }
   0x6   :  { %s705_s16 = smov 0   ;;  %s707_s17 = smov 0  }
   0x7 LB: > { %s423_s18 = sadd.s32 4294967295, %s668_s17   ;;  %s424_s19 = sadd.s32 4294967294, %s668_s17   ;;  %s668_s17 = sphi %s707_s17, %s20_s17   ;;  %s664_s16 = sphi %s705_s16, %s952_s16   ;;  %s660_s15 = sphi %s703_s15, %s951_s15   ;;  %s656_s14 = sphi %s701_s14, %s950_s14   ;;  %s652_s13 = sphi %s699_s13, %s949_s13   ;;  %s648_s12 = sphi %s697_s12, %s948_s12  }
   0x8   : > { %s93_s20 = sadd.s32 1, %s656_s14  ;;  %p100_p0 = scmp.ne.s32.totalorder %s656_s14, %s652_s13 }
   0x9   : > { %p101_p1 = scmp.eq.s32.totalorder %s668_s17, 0  ;;  %p106_p2 = scmp.ne.s32.totalorder %s652_s13, %s648_s12 }
   0xa   : > { %p735_p3 = scmp.eq.s32.totalorder %s423_s18, 0  ;;  %p132_p4 = scmp.eq.s32.totalorder %s423_s18, 1 }
   0xb   : > { %p739_p5 = por %p101_p1, %p100_p0  ;;  %p138_p6 = scmp.eq.s32.totalorder %s424_s19, 1 }
   0xc   : > { %s931_s21 = scalar_select %p735_p3, 1, 0 }
   0xd   : > { %p745_p7 = por %p735_p3, %p106_p2  ;;  %p749_p8 = por %p132_p4, %p100_p0 }
   0xe   : > { %p753_p9 = por %p138_p6, %p106_p2  ;;  %p425_p10 = scmp.ge.s32.totalorder %s668_s17, 1 }
   0xf   : > { %s933_s23 = scalar_select %p745_p7, 1, 0 }
  0x10   : > { %s934_s24 = scalar_select %p749_p8, 1, 0 }
  0x11   : > { %s935_s25 = scalar_select %p753_p9, 1, 0 }
  0x12   : > { %p145_p11 = scmp.lt.s32.totalorder %s668_s17, 3  ;;  %s670_s27 = smov [#allocation2]  }
  0x13   : > { %s161_s28 = sshll.u32 %s670_s27, 4  ;;  %p468_p1 = scmp.lt.s32.totalorder %s668_s17, 2  ;;  %s162_s28 = int_to_ptr.vmem [resolvable:$true] %s161_s28 }
  0x14   : > { %p760_p13 = pnand %p425_p10, %p145_p11  ;;  %s32_s4 = sadd.s32 1, %s664_s16 }
  0x15   : > { %p769_p4 = pnand %p468_p1, %p739_p5  ;;  %p780_p6 = scmp.ge.s32.totalorder %s32_s4, 2 }
  0x16   : > { %s936_s26 = scalar_select %p760_p13, 1, 0 }
  0x17   : > { %p455_p0 = pneg %p760_p13  ;;  %s180_s6 = sand.u32 1, %s656_s14  }
  0x18   : > { %s937_s29 = scalar_select %p769_p4, 1, 0 }
  0x19   : > { %p775_p2 = pnand %p455_p0, %p735_p3  ;;  %s524_s9 = scalar_lea.hbm %s921_s0, 32 }
  0x1a   : > { %s939_s5 = scalar_select %p780_p6, 1, 0 }
  0x1b   : > { %p525_p5 = scmp.ne.s32.totalorder %s921_s0, %s524_s9  ;;  %p526_p10 = pneg %p775_p2 }
  0x1c   : > { %p531_p0 = scmp.lt.u32.totalorder %s524_s9, %s921_s0 }
  0x1d   : > { %p527_p11 = pnand %p526_p10, %p525_p5 }
  0x1f   : > { %p528_p1 = pneg %p527_p11 }
  0x21   : > { %p533_p12 = pnand %p531_p0, %p528_p1 }
  0x23   : > { %536 = shalt.err (!%p533_p12)
}
  0x24   : > { %s537_s22 = scalar_lea.vmem %s162_s28, 32  ;;  %p545_p3 = scmp.lt.s32.totalorder %s162_s28, %s162_s28 }
  0x25   : > { %p538_p9 = scmp.ne.s32.totalorder %s162_s28, %s537_s22  ;;  %p546_p13 = scmp.lt.s32.totalorder %s537_s22, %s537_s22 }
  0x27   : > { %p540_p8 = pnand %p538_p9, %p526_p10  ;;  %p547_p4 = por %p546_p13, %p545_p3 }
  0x29   : > { %p541_p7 = pneg %p540_p8 }
  0x2b   : > { %p548_p6 = pnand %p547_p4, %p541_p7 }
  0x2d   : > { %551 = shalt.err (!%p548_p6)
}
  0x2e   : > { %458 = dma.hbm_to_vmem [thread:$0]  (!%p775_p2), %s921_s0, 32, %s162_s28, [#allocation3]  }
  0x2f   : > { %p940_p9 = scmp.ne.s32.totalorder %s939_s5, 0  ;;  %s429_s8 = sshll.u32 %s180_s6, 5 }
  0x30   : > { %s444_s10 = sshll.u32 %s664_s16, 9  ;;  %s184_s19 = scalar_lea.vmem [#allocation5], %s429_s8 }
  0x31   : > { %s954_s4 = smov (%p940_p9, %s32_s4), 0  ;;  %s811_s18 = scalar_lea.hbm %s923_s2, %s444_s10 }
  0x32   : > { %s88_s9 = ssub.s32 %s664_s16, %s954_s4  ;;  %s194_s22 = sshll.u32 %s184_s19, 4  ;;  %s818_s22 = int_to_ptr.vmem [resolvable:$true] %s194_s22 }
  0x33   : > { %p91_p3 = scmp.eq.s32.totalorder %s88_s9, 0  ;;  %s820_s5 = scalar_lea.sflag [#allocation6], %s180_s6 }
  0x34   : > { %s552_s27 = scalar_lea.hbm %s811_s18, 512  ;;  %p941_p8 = scmp.ne.s32.totalorder %s937_s29, 0 }
  0x35   : > { %s816_s28 = scalar_select %p91_p3, %s656_s14, %s93_s20  }
  0x36   : > { %p553_p7 = scmp.ne.s32.totalorder %s811_s18, %s552_s27  ;;  %p554_p12 = pneg %p941_p8 }
  0x37   : > { %s557_s8 = scalar_lea.hbm %s923_s2, 1024  ;;  %p558_p2 = scmp.lt.u32.totalorder %s811_s18, %s923_s2 }
  0x38   : > { %p555_p13 = pnand %p554_p12, %p553_p7  ;;  %p559_p6 = scmp.lt.u32.totalorder %s557_s8, %s552_s27 }
  0x39   : > { %p561_p10 = scmp.lt.u32.totalorder %s552_s27, %s811_s18 }
  0x3a   : > { %p556_p4 = pneg %p555_p13  ;;  %p560_p5 = por %p559_p6, %p558_p2 }
  0x3c   : > { %p562_p11 = por %p561_p10, %p560_p5 }
  0x3e   : > { %p563_p1 = pnand %p562_p11, %p556_p4 }
  0x40   : > { %566 = shalt.err (!%p563_p1)
}
  0x41   : > { %s567_s20 = scalar_lea.vmem %s818_s22, 512  ;;  %s671_s6 = smov [#allocation5]  }
  0x42   : > { %p568_p0 = scmp.ne.s32.totalorder %s818_s22, %s567_s20  ;;  %s572_s11 = sshll.u32 %s671_s6, 4  ;;  %s573_s11 = int_to_ptr.vmem [resolvable:$false] %s572_s11 }
  0x43   : > { %s574_s19 = scalar_lea.vmem %s573_s11, 1024  ;;  %p575_p7 = scmp.lt.s32.totalorder %s818_s22, %s573_s11 }
  0x44   : > { %p570_p9 = pnand %p568_p0, %p554_p12  ;;  %p576_p13 = scmp.lt.s32.totalorder %s574_s19, %s567_s20 }
  0x46   : > { %p571_p3 = pneg %p570_p9  ;;  %p577_p2 = por %p576_p13, %p575_p7 }
  0x48   : > { %p578_p6 = pnand %p577_p2, %p571_p3 }
  0x4a   : > { %581 = shalt.err (!%p578_p6)
}
  0x4b   : > { %s672_s27 = smov 256   ;;  %s673_s7 = smov 16  }
  0x4c   : > { %462 = dma.hbm_to_vmem [thread:$0]  (!%p941_p8), %s811_s18, 512, %s818_s22, %s820_s5, %s672_s27, %s672_s27, %s673_s7  }
  0x4d   : > { %p942_p12 = scmp.ne.s32.totalorder %s936_s26, 0 }
  0x4e   : > { %p943_p4 = scmp.ne.s32.totalorder (!%p942_p12), %s931_s21, 0 }
  0x4f   : > { %206 = sbr.rel (%p942_p12) target bundleno = 119 (0x77), region = 32 }
  0x56   : > { %635 = dma.done.wait (%p943_p4), [#allocation3], 32  }
  0x57   : > { %637 = vsyncadd (%p943_p4), [#allocation3], 4294967264  ;;  %s855_s9 = sand.u32 1, %s652_s13   ;;  %p944_p5 = scmp.ne.s32.totalorder %s933_s23, 0 }
  0x58   : > { %s435_s8 = sshll.u32 %s855_s9, 5  ;;  %s213_s10 = scalar_lea.sflag [#allocation6], %s855_s9 }
  0x59   : > { %s216_s30 = scalar_lea.vmem [#allocation5], %s435_s8 }
  0x5a   : > { %639 = dma.done.wait (%p944_p5), %s213_s10, 512  }
  0x5b   : > { %641 = vsyncadd (%p944_p5), %s213_s10, 4294966784  ;;  %v259_v0 = vlaneseq  ;;  %v253_v4 = vld [vmem:[#allocation2] sm:$0x3]  ;;  %v254_v5 = vld [vmem:[%s216_s30] sm:$0xff]  ;;  %s242_s29 = scalar_lea.vmem [#allocation7], %s435_s8  ;;  %s446_s23 = sshll.u32 %s660_s15, 9 }
  0x5c   : > { %v273_v6 = vld [vmem:[%s922_s1] sm:$0x3]  ;;  %s310_s18 = sshll.u32 %s242_s29, 4  ;;  %v255_v9 = vld [vmem:[%s216_s30 + $0x8] sm:$0xff]  ;;  %v256_v12 = vld [vmem:[%s216_s30 + $0x10] sm:$0xff]  ;;  %s872_s20 = scalar_lea.hbm %s924_s3, %s446_s23  ;;  %s867_s18 = int_to_ptr.vmem [resolvable:$true] %s310_s18 }
  0x5d   : > { %v260_v1 = vshrl.u32 %v259_v0, 7  ;;  %v257_v13 = vld [vmem:[%s216_s30 + $0x18] sm:$0xff]  ;;  %s294_s15 = scalar_lea.sflag [#allocation4], %s855_s9  ;;  %s582_s6 = scalar_lea.vmem %s867_s18, 512 }
  0x5e   : > { %p583_p8 = scmp.ne.s32.totalorder %s867_s18, %s582_s6  ;;  %p945_p10 = scmp.ne.s32.totalorder %s934_s24, 0 }
  0x5f   : > { %v261_v2 = vsub.s32 0, %v260_v1  ;;  %v265_v3 = vsub.s32 1, %v260_v1  ;;  %s674_s11 = smov [#allocation7]  }
  0x60   : > { %p584_p11 = pnand %p583_p8, %p945_p10  ;;  %s586_s19 = sshll.u32 %s674_s11, 4  ;;  %s587_s19 = int_to_ptr.vmem [resolvable:$false] %s586_s19 }
  0x61   : > { %v262_v7 = vrot.slane %v253_v4, %v261_v2  ;;  %v278_v8 = vrot.slane %v273_v6, %v261_v2  ;;  %v266_v10 = vrot.slane %v253_v4, %v265_v3  ;;  %v282_v11 = vrot.slane %v273_v6, %v265_v3  ;;  %s588_s27 = scalar_lea.vmem %s587_s19, 1024  ;;  %p589_p0 = scmp.lt.s32.totalorder %s867_s18, %s587_s19 }
  0x62   : > { %p585_p1 = pneg %p584_p11  ;;  %p590_p9 = scmp.lt.s32.totalorder %s588_s27, %s582_s6 }
  0x63   : > { %v269_v14 = vmul.f32 %v262_v7, %v254_v5  ;;  %v270_v15 = vmul.f32 %v266_v10, %v255_v9  ;;  %v271_v16 = vmul.f32 %v262_v7, %v256_v12  ;;  %v272_v17 = vmul.f32 %v266_v10, %v257_v13 }
  0x64   : > { %p591_p3 = por %p590_p9, %p589_p0 }
  0x65   : > { %v285_v18 = vadd.f32 %v278_v8, %v269_v14  ;;  %v286_v19 = vadd.f32 %v282_v11, %v270_v15  ;;  %v287_v20 = vadd.f32 %v278_v8, %v271_v16  ;;  %v288_v21 = vadd.f32 %v282_v11, %v272_v17 }
  0x66   : > { %p592_p7 = pnand %p591_p3, %p585_p1 }
  0x67   : > { %289 = vst [vmem:[%s242_s29] sm:$0xff] %v285_v18  ;;  %290 = vst [vmem:[%s242_s29 + $0x8] sm:$0xff] %v286_v19 }
  0x68   : > { %291 = vst [vmem:[%s242_s29 + $0x10] sm:$0xff] %v287_v20  ;;  %292 = vst [vmem:[%s242_s29 + $0x18] sm:$0xff] %v288_v21 }
  0x69   : > { %595 = shalt.err (!%p592_p7)
}
  0x6a   : > { %s596_s7 = scalar_lea.hbm %s872_s20, 512  ;;  %s600_s30 = scalar_lea.hbm %s924_s3, 1024 }
  0x6b   : > { %p597_p13 = scmp.ne.s32.totalorder %s872_s20, %s596_s7  ;;  %p601_p12 = scmp.lt.u32.totalorder %s872_s20, %s924_s3 }
  0x6c   : > { %p602_p4 = scmp.lt.u32.totalorder %s600_s30, %s596_s7  ;;  %p604_p8 = scmp.lt.u32.totalorder %s596_s7, %s872_s20 }
  0x6d   : > { %p598_p2 = pnand %p597_p13, %p945_p10 }
  0x6e   : > { %p603_p5 = por %p602_p4, %p601_p12 }
  0x6f   : > { %p599_p6 = pneg %p598_p2 }
  0x70   : > { %p605_p11 = por %p604_p8, %p603_p5 }
  0x72   : > { %p606_p1 = pnand %p605_p11, %p599_p6 }
  0x74   : > { %609 = shalt.err (!%p606_p1)
}
  0x75   : > { %s675_s29 = smov 256   ;;  %s676_s23 = smov 16  }
  0x76   : > { %453 = dma.vmem_to_hbm [thread:$0]  (%p945_p10), %s867_s18, 512, %s872_s20, %s294_s15, %s675_s29, %s675_s29, %s676_s23  }
  0x77 PF: > { %s325_s22 = sand.u32 1, %s648_s12   ;;  %p946_p0 = scmp.ne.s32.totalorder %s935_s25, 0 }
  0x78   : > { %p947_p9 = scmp.ge.s32.totalorder %s668_s17, 2  ;;  %s326_s5 = scalar_lea.sflag [#allocation4], %s325_s22 }
  0x7a   : > { %p464_p3 = pnand %p947_p9, %p946_p0 }
  0x7c   : > { %643 = dma.done.wait (!%p464_p3), %s326_s5, 512  }
  0x7d   : > { %645 = vsyncadd (!%p464_p3), %s326_s5, 4294966784  ;;  %s20_s17 = sadd.s32 1, %s668_s17   ;;  %s948_s12 = smov %s652_s13 }
  0x7e   : > { %p17_p7 = scmp.ge.s32.totalorder %s20_s17, 4   ;;  %s949_s13 = smov %s656_s14 }
  0x7f   : > { %s950_s14 = smov %s816_s28  ;;  %s951_s15 = smov %s664_s16 }
  0x80   : > { %s952_s16 = smov %s954_s4  ;;  %19 = sbr.rel (!%p17_p7) target bundleno = 7 (0x7), region = 86 }
  0x87   :  { %331 = vsyncpa [#allocation3], 1 }
  0x88   :  { %333 = vsyncpa [#allocation3 + $0x1], 1 }
  0x89   :  { %334 = vsyncpa [#allocation6], 1 }
  0x8a   :  { %336 = vsyncpa [#allocation6 + $0x1], 1 }
  0x8b   :  { %337 = vsyncpa [#allocation4], 1 }
  0x8c   :  { %339 = vsyncpa [#allocation4 + $0x1], 1 }

</bundles_post_ra>
